<compile_context>
chip_gen: v5e
topology: v5e:2x2
jax: 0.10.0
libtpu: 0.0.40
codegen_flags: <defaults>
</compile_context>

<pallas_src>
import functools
import math

import jax
import jax.numpy as jnp
from jax.experimental import pallas as pl
from jax.experimental.pallas import tpu as pltpu


def _round_up(x, m):
    return ((x + m - 1) // m) * m


def _recon_loss_kernel(x_ref, t_ref, m_ref, e_ref, num_ref, *, n_strips):
    """One (TB, TK) tile of sum((x - t)^2 * w), w expanded from the patch mask.

    x_ref, t_ref : (TB, TK)  activations (f32 or bf16)
    m_ref        : (TB, NPp) bf16 0/1 patch mask for this row block
    e_ref        : (NPp, TK) bf16 0/1 expansion matrix for this column tile
    num_ref      : (1, 8, 128) f32 partial sums, resident across the last
                   (reduction) grid axis.
    """
    j = pl.program_id(2)

    @pl.when(j == 0)
    def _init():
        num_ref[...] = jnp.zeros_like(num_ref)

    tk = x_ref.shape[1]

    def strip(s, acc):
        r0 = pl.multiple_of(s * 8, 8)
        x = x_ref[pl.ds(r0, 8), :].astype(jnp.float32)
        t = t_ref[pl.ds(r0, 8), :].astype(jnp.float32)
        # Per-element weights for these 8 rows via the (otherwise idle) MXU.
        # Both operands are exactly 0/1 in bf16 -> exact result.
        w = jnp.dot(m_ref[pl.ds(r0, 8), :], e_ref[...],
                    preferred_element_type=jnp.float32)
        d = x - t
        return acc + d * d * w

    acc = jax.lax.fori_loop(0, n_strips, strip,
                            jnp.zeros((8, tk), jnp.float32), unroll=True)

    # Fold lanes TK -> 128 (static aligned slices, pure VPU adds).
    out = acc[:, 0:128]
    for c0 in range(128, tk, 128):
        out = out + acc[:, c0:c0 + 128]
    num_ref[...] += out[None]


def reconstruction_loss(inp, target, mask, patch_size):
    """JAX/Pallas equivalent of ReconstructionLoss.forward.

    inp, target: (B, L, C)   mask: (B, C, n_patches)   -> scalar f32
    """
    B, L, C = target.shape
    S = int(patch_size)
    NP = math.ceil(L / S)

    def last_channel(a):
        a = a[:, :, -1]
        return a if jnp.issubdtype(a.dtype, jnp.floating) else a.astype(jnp.float32)

    x2 = last_channel(inp)                              # (B, L), f32 or bf16
    t2 = last_channel(target)                           # (B, L)
    m = mask[:, -1, :].astype(jnp.float32)              # (B, NP)

    # --- tiny scalars kept in plain JAX (denominator + all-zero fallback) ---
    msum = jnp.sum(m)                                   # exact mask.sum()
    k0 = min(L, S)                                      # loss[0][0]
    d0 = x2[0, :k0].astype(jnp.float32) - t2[0, :k0].astype(jnp.float32)
    fallback = jnp.sum(d0 * d0) / S                     # zero-padded tail -> 0

    # --- tiling: pad UP to lane-dense tiles ---------------------------------
    TB = min(128, _round_up(B, 8))
    Bp = _round_up(B, TB)
    nbi = Bp // TB
    NPp = _round_up(NP, 8)

    TK = min(512, _round_up(L, 128))
    while TK > 128 and NPp * TK * 2 > (2 << 20):        # keep E tile modest
        TK //= 2
    nbj_total = _round_up(L, TK) // TK
    # If there is a single row block (small B), split the column sweep into
    # two "parallel" chunks so both v7x TensorCores get grid blocks.
    ncc = 2 if (nbi == 1 and nbj_total >= 2) else 1
    Kp = _round_up(L, ncc * TK)
    nbj = Kp // (ncc * TK)

    x2 = jnp.pad(x2, ((0, Bp - B), (0, Kp - L)))
    t2 = jnp.pad(t2, ((0, Bp - B), (0, Kp - L)))
    # 0/1 patch mask (bf16-exact); zero rows/cols in the padding.
    m_b = jnp.pad(m, ((0, Bp - B), (0, NPp - NP))).astype(jnp.bfloat16)
    # Expansion matrix: E[p, c] = 1 iff column c belongs to patch p.
    col_patch = jnp.arange(Kp, dtype=jnp.int32) // S
    expand = (col_patch[None, :] ==
              jnp.arange(NPp, dtype=jnp.int32)[:, None]).astype(jnp.bfloat16)

    kernel = functools.partial(_recon_loss_kernel, n_strips=TB // 8)

    partials = pl.pallas_call(
        kernel,
        grid=(nbi, ncc, nbj),
        in_specs=[
            pl.BlockSpec((TB, TK), lambda i, c, j: (i, c * nbj + j)),
            pl.BlockSpec((TB, TK), lambda i, c, j: (i, c * nbj + j)),
            pl.BlockSpec((TB, NPp), lambda i, c, j: (i, 0)),
            pl.BlockSpec((NPp, TK), lambda i, c, j: (0, c * nbj + j)),
        ],
        out_specs=pl.BlockSpec((1, 8, 128), lambda i, c, j: (i * ncc + c, 0, 0)),
        out_shape=jax.ShapeDtypeStruct((nbi * ncc, 8, 128), jnp.float32),
        compiler_params=pltpu.CompilerParams(
            dimension_semantics=("parallel", "parallel", "arbitrary")),
    )(x2, t2, m_b, expand)

    # numer = sum_{b,c} (x-t)^2 * mask[b, patch(c)] = patch_size * sum(loss_pp * mask)
    numer = jnp.sum(partials)
    main = numer / (S * jnp.maximum(msum, 1.0))

    # PyTorch: (loss*mask).sum()/mask.sum() if mask.sum() >= 1 else loss[0][0]
    return jnp.where(msum >= 1.0, main, fallback)


def _ref_loss(inp, target, mask, patch_size):
    """Pure-JAX mirror of the PyTorch forward (for silent sanity checks)."""
    B, L, C = target.shape
    n_p = math.ceil(L / patch_size)
    pad = n_p * patch_size - L

    def fold(x):
        x = x[:, :, -1].astype(jnp.float32)
        x = jnp.pad(x, ((0, 0), (0, pad)))
        return x.reshape(B, n_p, patch_size)

    l = jnp.mean((fold(inp) - fold(target)) ** 2, axis=-1)
    m = mask[:, -1, :].astype(jnp.float32)
    return jnp.where(m.sum() >= 1.0,
                     (l * m).sum() / jnp.maximum(m.sum(), 1.0),
                     l[0, 0])


if __name__ == "__main__":
    key = jax.random.PRNGKey(0)
    k1, k2, k3, k4, k5, k6 = jax.random.split(key, 6)

    # Check 1: small config (single tile, single strip), f32
    B, L, C, P = 2, 20, 4, 8
    n_p = math.ceil(L / P)
    inp = jax.random.normal(k1, (B, L, C), dtype=jnp.float32)
    tgt = jax.random.normal(k2, (B, L, C), dtype=jnp.float32)
    mask = (jax.random.uniform(k3, (B, C, n_p)) > 0.5).astype(jnp.float32)
    out = jax.block_until_ready(reconstruction_loss(inp, tgt, mask, P))
    ref = _ref_loss(inp, tgt, mask, P)
    assert jnp.allclose(out, ref, rtol=1e-4, atol=1e-6), (out, ref)

    # Check 2: all-zero mask -> fallback branch (loss[0][0])
    zmask = jnp.zeros_like(mask)
    out0 = jax.block_until_ready(reconstruction_loss(inp, tgt, zmask, P))
    ref0 = _ref_loss(inp, tgt, zmask, P)
    assert jnp.allclose(out0, ref0, rtol=1e-4, atol=1e-6), (out0, ref0)

    # Check 3: single row block + multiple column tiles -> ncc == 2 path,
    # L not a patch or tile multiple.
    B2, L2, C2, P2 = 24, 1200, 3, 16
    n_p2 = math.ceil(L2 / P2)
    inp2 = jax.random.normal(k4, (B2, L2, C2), dtype=jnp.float32)
    tgt2 = jax.random.normal(k5, (B2, L2, C2), dtype=jnp.float32)
    mask2 = (jax.random.uniform(jax.random.fold_in(key, 7),
                                (B2, C2, n_p2)) > 0.3).astype(jnp.float32)
    out2 = jax.block_until_ready(reconstruction_loss(inp2, tgt2, mask2, P2))
    ref2 = _ref_loss(inp2, tgt2, mask2, P2)
    assert jnp.allclose(out2, ref2, rtol=1e-4, atol=1e-6), (out2, ref2)

    # Check 4: multiple row blocks (nbi > 1) and bf16 activation passthrough.
    B3, L3, C3, P3 = 136, 700, 2, 10
    n_p3 = math.ceil(L3 / P3)
    inp3 = jax.random.normal(k6, (B3, L3, C3), dtype=jnp.float32).astype(jnp.bfloat16)
    tgt3 = jax.random.normal(jax.random.fold_in(key, 11),
                             (B3, L3, C3), dtype=jnp.float32).astype(jnp.bfloat16)
    mask3 = (jax.random.uniform(jax.random.fold_in(key, 13),
                                (B3, C3, n_p3)) > 0.5).astype(jnp.float32)
    out3 = jax.block_until_ready(reconstruction_loss(inp3, tgt3, mask3, P3))
    ref3 = _ref_loss(inp3, tgt3, mask3, P3)
    assert jnp.allclose(out3, ref3, rtol=1e-3, atol=1e-5), (out3, ref3)

    print("KERNEL_OK")
</pallas_src>

<mosaic_0001>
module attributes {stable_mosaic.version = 11 : i64} {
  func.func @_recon_loss_kernel(%arg0: i32, %arg1: i32, %arg2: i32, %arg3: memref<8x128xf32, #tpu.memory_space<vmem>>, %arg4: memref<8x128xf32, #tpu.memory_space<vmem>>, %arg5: memref<8x8xbf16, #tpu.memory_space<vmem>>, %arg6: memref<8x128xbf16, #tpu.memory_space<vmem>>, %arg7: memref<1x8x128xf32, #tpu.memory_space<vmem>>) attributes {dimension_semantics = [#tpu.dimension_semantics<parallel>, #tpu.dimension_semantics<parallel>, #tpu.dimension_semantics<arbitrary>], iteration_bounds = array<i64: 1, 1, 1>, scalar_prefetch = 0 : i64, scratch_operands = 0 : i64, tpu.core_type = #tpu.core_type<tc>, window_params = [{transform_indices = @transform_0, window_bounds = array<i64: 8, 128>}, {transform_indices = @transform_1, window_bounds = array<i64: 8, 128>}, {transform_indices = @transform_2, window_bounds = array<i64: 8, 8>}, {transform_indices = @transform_3, window_bounds = array<i64: 8, 128>}, {transform_indices = @transform_4, window_bounds = array<i64: 1, 8, 128>}]} {
    %c0_i32 = arith.constant 0 : i32
    %0 = arith.cmpi eq, %arg2, %c0_i32 : i32
    %1 = arith.extui %0 : i1 to i32
    %c0_i32_0 = arith.constant 0 : i32
    %2 = arith.cmpi ne, %1, %c0_i32_0 : i32
    scf.if %2 {
      %cst_13 = arith.constant 0.000000e+00 : f32
      %22 = vector.broadcast %cst_13 : f32 to vector<1x8x128xf32>
      %c0_14 = arith.constant 0 : index
      %c0_15 = arith.constant 0 : index
      %c0_16 = arith.constant 0 : index
      %23 = vector.load %arg7[%c0_14, %c0_15, %c0_16] : memref<1x8x128xf32, #tpu.memory_space<vmem>>, vector<1x8x128xf32>
      tpu.vector_store %arg7[%c0_14, %c0_15, %c0_16], %22 {strides = array<i32>} : memref<1x8x128xf32, #tpu.memory_space<vmem>>, vector<1x8x128xf32>,
    } else {
    }
    %cst = arith.constant 0.000000e+00 : f32
    %3 = vector.broadcast %cst : f32 to vector<8x128xf32>
    %c0_i32_1 = arith.constant 0 : i32
    %c8_i32 = arith.constant 8 : i32
    %4 = arith.muli %c0_i32_1, %c8_i32 : i32
    %5 = tpu.assume_multiple %4, 8 : i32
    %6 = arith.index_cast %5 : i32 to index
    %c0 = arith.constant 0 : index
    %7 = vector.load %arg3[%6, %c0] : memref<8x128xf32, #tpu.memory_space<vmem>>, vector<8x128xf32>
    %8 = arith.index_cast %5 : i32 to index
    %c0_2 = arith.constant 0 : index
    %9 = vector.load %arg4[%8, %c0_2] : memref<8x128xf32, #tpu.memory_space<vmem>>, vector<8x128xf32>
    %10 = arith.index_cast %5 : i32 to index
    %c0_3 = arith.constant 0 : index
    %11 = vector.load %arg5[%10, %c0_3] : memref<8x8xbf16, #tpu.memory_space<vmem>>, vector<8x8xbf16>
    %c0_4 = arith.constant 0 : index
    %c0_5 = arith.constant 0 : index
    %12 = vector.load %arg6[%c0_4, %c0_5] : memref<8x128xbf16, #tpu.memory_space<vmem>>, vector<8x128xbf16>
    %cst_6 = arith.constant dense<0.000000e+00> : vector<8x128xf32>
    %13 = tpu.matmul %11, %12, %cst_6 {dimension_numbers = #tpu.dot_dimension_numbers<[1], [0], [0], [1], [0, 0, 1, 1], [], []>} : vector<8x8xbf16>, vector<8x128xbf16>, vector<8x128xf32> -> vector<8x128xf32>
    %14 = arith.subf %7, %9 : vector<8x128xf32>
    %15 = arith.mulf %14, %14 : vector<8x128xf32>
    %16 = arith.mulf %15, %13 : vector<8x128xf32>
    %17 = arith.addf %3, %16 : vector<8x128xf32>
    %c1_i32 = arith.constant 1 : i32
    %c0_7 = arith.constant 0 : index
    %c0_8 = arith.constant 0 : index
    %c0_9 = arith.constant 0 : index
    %18 = vector.load %arg7[%c0_7, %c0_8, %c0_9] : memref<1x8x128xf32, #tpu.memory_space<vmem>>, vector<1x8x128xf32>
    %19 = vector.shape_cast %17 : vector<8x128xf32> to vector<1x8x128xf32>
    %20 = arith.addf %18, %19 : vector<1x8x128xf32>
    %c0_10 = arith.constant 0 : index
    %c0_11 = arith.constant 0 : index
    %c0_12 = arith.constant 0 : index
    %21 = vector.load %arg7[%c0_10, %c0_11, %c0_12] : memref<1x8x128xf32, #tpu.memory_space<vmem>>, vector<1x8x128xf32>
    tpu.vector_store %arg7[%c0_10, %c0_11, %c0_12], %20 {strides = array<i32>} : memref<1x8x128xf32, #tpu.memory_space<vmem>>, vector<1x8x128xf32>,
    return
  }
  func.func @transform_0(%arg0: i32, %arg1: i32, %arg2: i32) -> (i32, i32) {
    %c1_i32 = arith.constant 1 : i32
    %0 = arith.muli %arg1, %c1_i32 : i32
    %1 = arith.addi %0, %arg2 : i32
    %c0_i32 = arith.constant 0 : i32
    return %arg0, %1 : i32, i32
  }
  func.func @transform_1(%arg0: i32, %arg1: i32, %arg2: i32) -> (i32, i32) {
    %c1_i32 = arith.constant 1 : i32
    %0 = arith.muli %arg1, %c1_i32 : i32
    %1 = arith.addi %0, %arg2 : i32
    %c0_i32 = arith.constant 0 : i32
    return %arg0, %1 : i32, i32
  }
  func.func @transform_2(%arg0: i32, %arg1: i32, %arg2: i32) -> (i32, i32) {
    %c0_i32 = arith.constant 0 : i32
    %c0_i32_0 = arith.constant 0 : i32
    return %arg0, %c0_i32 : i32, i32
  }
  func.func @transform_3(%arg0: i32, %arg1: i32, %arg2: i32) -> (i32, i32) {
    %c1_i32 = arith.constant 1 : i32
    %0 = arith.muli %arg1, %c1_i32 : i32
    %1 = arith.addi %0, %arg2 : i32
    %c0_i32 = arith.constant 0 : i32
    %c0_i32_0 = arith.constant 0 : i32
    return %c0_i32, %1 : i32, i32
  }
  func.func @transform_4(%arg0: i32, %arg1: i32, %arg2: i32) -> (i32, i32, i32) {
    %c1_i32 = arith.constant 1 : i32
    %0 = arith.muli %arg0, %c1_i32 : i32
    %1 = arith.addi %0, %arg1 : i32
    %c0_i32 = arith.constant 0 : i32
    %c0_i32_0 = arith.constant 0 : i32
    %c0_i32_1 = arith.constant 0 : i32
    return %1, %c0_i32, %c0_i32_0 : i32, i32, i32
  }
}

</mosaic_0001>

<bundles_post_ra>
// kernel: tpu_custom_call.1
= control target key start
LH: loop header
LB: loop body
LE: loop exit
PB: predicated region body
PF: predicated region fallthrough
CT: control target
= control target key end

     0   :  { %9 = vsyncpa [#allocation3], 0  ;;  %s326_s0 = inlined_call_operand.hbm [shape: f32[8,128], index: 0, kind: input, shape index: {}]   ;;  %s327_s1 = inlined_call_operand.hbm [shape: f32[8,128], index: 1, kind: input, shape index: {}]   ;;  %s328_s2 = inlined_call_operand.hbm [shape: bf16[8,8], index: 2, kind: input, shape index: {}]   ;;  %s329_s3 = inlined_call_operand.hbm [shape: bf16[8,128], index: 3, kind: input, shape index: {}]   ;;  %s330_s4 = inlined_call_operand.hbm [shape: f32[1,8,128], index: 4, kind: output, shape index: {}]  }
   0x1   :  { %10 = vsyncpa [#allocation6], 0 }
   0x2   :  { %11 = vsyncpa [#allocation9], 0  ;;  %s35_s17 = sshll.u32 %s327_s1, 4  ;;  %s36_s17 = int_to_ptr.hbm [resolvable:$true] %s35_s17 }
   0x3   :  { %12 = vsyncpa [#allocation4], 0  ;;  %s281_s18 = smov [#allocation5]   ;;  %s21_s22 = sshll.u32 %s326_s0, 4  ;;  %s22_s22 = int_to_ptr.hbm [resolvable:$true] %s21_s22 }
   0x4   :  { %s37_s19 = sshll.u32 %s281_s18, 4  ;;  %s282_s23 = smov [#allocation2]   ;;  %s38_s19 = int_to_ptr.vmem [resolvable:$true] %s37_s19 }
   0x5   :  { %40 = dma.hbm_to_vmem [thread:$0]  %s36_s17, 128, %s38_s19, [#allocation6]  }
   0x6   :  { %s23_s24 = sshll.u32 %s282_s23, 4  ;;  %s46_s27 = sshll.u32 %s328_s2, 4  ;;  %s24_s24 = int_to_ptr.vmem [resolvable:$true] %s23_s24  ;;  %s47_s27 = int_to_ptr.hbm [resolvable:$true] %s46_s27 }
   0x7   :  { %26 = dma.hbm_to_vmem [thread:$0]  %s22_s22, 128, %s24_s24, [#allocation3]  }
   0x8   :  { %s60_s29 = sshll.u32 %s329_s3, 4  ;;  %s283_s30 = smov [#allocation7]   ;;  %s61_s29 = int_to_ptr.hbm [resolvable:$true] %s60_s29 }
   0x9   :  { %s48_s5 = sshll.u32 %s283_s30, 4  ;;  %s284_s0 = smov [#allocation8]   ;;  %s49_s5 = int_to_ptr.vmem [resolvable:$true] %s48_s5 }
   0xa   :  { %51 = dma.hbm_to_vmem [thread:$0]  %s47_s27, 64, %s49_s5, [#allocation6]  }
   0xb   :  { %s62_s6 = sshll.u32 %s284_s0, 4  ;;  %s63_s6 = int_to_ptr.vmem [resolvable:$true] %s62_s6 }
   0xc   :  { %65 = dma.hbm_to_vmem [thread:$0]  %s61_s29, 64, %s63_s6, [#allocation9]  }
   0xd   :  { %273 = dma.done.wait [#allocation3], 128  }
   0xe   :  { %274 = vsyncadd [#allocation3], 4294967168 }
   0xf   :  { %275 = dma.done.wait [#allocation6], 192  }
  0x10   :  { %276 = vsyncadd [#allocation6], 4294967104 }
  0x11   :  { %277 = dma.done.wait [#allocation9], 64  }
  0x12   :  { %278 = vsyncadd [#allocation9], 4294967232  ;;  %vm100_vm0 = vcmask 1043456   ;;  %v95_v0 = vld [vmem:[#allocation8] sm:$0xf]  ;;  %vm96_vm1 = vcmask 64512  }
  0x13   :  { %v102_v1 = vsel %vm100_vm0, %v95_v0, 0  ;;  %v94_v2 = vld [vmem:[#allocation7] sm:$0xf]  ;;  %v92_v3 = vld [vmem:[#allocation2] sm:$0xff]  ;;  %v93_v4 = vld [vmem:[#allocation5] sm:$0xff]  ;;  %s285_s2 = smov [#allocation10]  }
  0x14   :  { %111 = vmatpush.bf16.msra.mxu0 %v102_v1  ;;  %v117_v5 = vsub.f32 %v92_v3, %v93_v4  ;;  %s132_s3 = sshll.u32 %s285_s2, 4  ;;  %s134_s9 = sshll.u32 %s330_s4, 4  ;;  %s133_s3 = int_to_ptr.vmem [resolvable:$true] %s132_s3  ;;  %s135_s9 = int_to_ptr.hbm [resolvable:$true] %s134_s9 }
  0x16   :  { %v118_v6 = vmul.f32 %v117_v5, %v117_v5 }
  0x17   :  { %146 = vmatmul.msk.bf16.vlgmr.msra.gmra.mxu0 %vm96_vm1, %v94_v2 }
  0x94   :  { %v113_v7 = vpop.f32.mrf.mxu0 }
  0x95   :  { %v119_v8 = vmul.f32 %v118_v6, %v113_v7 }
  0x97   :  { %123 = vst [vmem:[#allocation10] sm:$0xff] %v119_v8 }
  0x98   :  { %137 = dma.vmem_to_hbm [thread:$0]  %s133_s3, 128, %s135_s9, [#allocation4]  }
  0x9c   :  { %v115_v9 = vpop.f32.mrf.mxu0 }
  0x9d   :  { %279 = dma.done.wait [#allocation4], 128  }
  0x9e   :  { %280 = vsyncadd [#allocation4], 4294967168 }
  0x9f   :  { %142 = vsyncpa [#allocation3], 1 }
  0xa0   :  { %143 = vsyncpa [#allocation6], 1 }
  0xa1   :  { %144 = vsyncpa [#allocation9], 1 }
  0xa2   :  { %145 = vsyncpa [#allocation4], 1 }

</bundles_post_ra>
